<compile_context>
chip_gen: v7x
topology: tpu7x:2x2x1
jax: 0.10.0
libtpu: 0.0.40
codegen_flags: <defaults>
</compile_context>

<pallas_src>
import functools
import math

import jax
import jax.numpy as jnp
from jax.experimental import pallas as pl
from jax.experimental.pallas import tpu as pltpu


# ----------------------------------------------------------------------------
# Kernels
# ----------------------------------------------------------------------------
def _ws_single_pass_kernel(x_ref, w_ref, o_ref, *, approx):
    """Block holds the full softmax dim: (TR, D) x, (TR, D) or (1, D) w."""
    x = x_ref[...].astype(jnp.float32)
    w = w_ref[...].astype(jnp.float32)          # broadcasts if (1, D)
    m = jnp.max(x, axis=-1, keepdims=True)      # stable softmax max (XLU)
    e = w * jnp.exp(x - m)                      # weighted exponentials (EUP/VPU)
    denom = jnp.sum(e, axis=-1, keepdims=True)
    o_ref[...] = (e * pl.reciprocal(denom, approx=approx)).astype(o_ref.dtype)


def _ws_two_pass_kernel(x_ref, w_ref, o_ref, m_sc, l_sc, *,
                        d_total, d_block, mask_tail, approx):
    """Online (flash-style) weighted softmax with the D axis tiled.

    grid = (row_blocks, 2, d_blocks); pass p=0 accumulates the running max m
    and weighted denominator l in VMEM scratch, pass p=1 writes the output.
    """
    p = pl.program_id(1)
    k = pl.program_id(2)

    x = x_ref[...].astype(jnp.float32)
    w = w_ref[...].astype(jnp.float32)          # broadcasts if (1, TD)

    if mask_tail:
        col = k * d_block + jax.lax.broadcasted_iota(jnp.int32, x.shape, x.ndim - 1)
        valid = col < d_total
        x = jnp.where(valid, x, -jnp.inf)       # keep garbage lanes out of max
    else:
        valid = None

    @pl.when(jnp.logical_and(p == 0, k == 0))
    def _():
        m_sc[...] = jnp.full_like(m_sc[...], -jnp.inf)
        l_sc[...] = jnp.zeros_like(l_sc[...])

    @pl.when(p == 0)
    def _():
        m_prev = m_sc[...]
        m_new = jnp.maximum(m_prev, jnp.max(x, axis=-1, keepdims=True))
        e = w * jnp.exp(x - m_new)
        if mask_tail:
            e = jnp.where(valid, e, 0.0)        # keep garbage lanes out of sum
        l_sc[...] = l_sc[...] * jnp.exp(m_prev - m_new) + jnp.sum(
            e, axis=-1, keepdims=True)
        m_sc[...] = m_new

    @pl.when(p == 1)
    def _():
        inv_l = pl.reciprocal(l_sc[...], approx=approx)
        o_ref[...] = (w * jnp.exp(x - m_sc[...]) * inv_l).astype(o_ref.dtype)


# ----------------------------------------------------------------------------
# Wrapper
# ----------------------------------------------------------------------------
def _round_up(a, m):
    return (a + m - 1) // m * m


def _vmem_params():
    """(vmem_limit_bytes, block_buffer_budget_bytes), sized per chip gen."""
    try:
        info = pltpu.get_tpu_info()
        cap = int(getattr(info, "vmem_capacity_bytes", 0) or 0)
    except Exception:
        cap = 0
    if cap <= 0:
        cap = 64 << 20                       # conservative default (v7x-sized)
    vmem_limit = min(cap // 2, 64 << 20)     # scoped limit with headroom
    block_budget = vmem_limit // 2           # spent on pipeline block buffers
    return vmem_limit, block_budget


@functools.partial(jax.jit, static_argnames=("dim", "d_block"))
def weight_softmax(x, weight, dim=None, d_block=None):
    """Pallas TPU weighted softmax. `weight` must broadcast to x.shape.

    `d_block` (multiple of 128) forces the D-tiled online path (testing knob).
    """
    if dim is None:
        dim = x.ndim - 1
    dim = dim % x.ndim

    # Right-align weight's rank with x (torch-style broadcasting).
    w = weight
    if w.ndim < x.ndim:
        w = w.reshape((1,) * (x.ndim - w.ndim) + w.shape)

    # Move the softmax axis last; flatten everything else into rows.
    xm = jnp.moveaxis(x, dim, -1)
    wm = jnp.moveaxis(w, dim, -1)
    lead = xm.shape[:-1]
    D = xm.shape[-1]
    R = int(math.prod(lead)) if lead else 1
    x2 = xm.reshape(R, D)

    # Weight layout: do NOT materialize a full broadcast in HBM when the
    # weight is shared across rows (all leading dims == 1).
    if all(s == 1 for s in wm.shape[:-1]):
        w_shared = True
        w2 = jnp.broadcast_to(wm.reshape(1, wm.shape[-1]), (1, D))
    elif wm.shape == xm.shape:
        w_shared = False
        w2 = wm.reshape(R, D)
    else:
        # Partial broadcast (varies on some leading axes only): rare fallback.
        w_shared = False
        w2 = jnp.broadcast_to(wm, xm.shape).reshape(R, D)

    x_bytes = x2.dtype.itemsize
    o_bytes = jnp.dtype(x.dtype).itemsize
    w_bytes = w2.dtype.itemsize
    # Bytes per element streamed through VMEM block buffers (double-buffered
    # inputs/output) plus ~8B for in-kernel f32 temporaries.
    per_elem = 2 * x_bytes + 2 * o_bytes + 8
    if not w_shared:
        per_elem += 2 * w_bytes

    vmem_limit, block_budget = _vmem_params()
    approx = jnp.dtype(x.dtype).itemsize < 4   # EUP vrcp for bf16/fp16 outputs

    use_two_pass = (d_block is not None) or (D * 8 * per_elem > block_budget)

    if not use_two_pass:
        # --- single pass: the whole softmax dim fits in one block ---
        tr = block_budget // (D * per_elem)
        tr = max(8, min(1024, tr))
        tr = min(tr, _round_up(R, 8))
        tr = max(8, (tr // 8) * 8)

        w_spec = (pl.BlockSpec((1, D), lambda i: (0, 0)) if w_shared
                  else pl.BlockSpec((tr, D), lambda i: (i, 0)))
        out2 = pl.pallas_call(
            functools.partial(_ws_single_pass_kernel, approx=approx),
            out_shape=jax.ShapeDtypeStruct((R, D), x.dtype),
            grid_spec=pltpu.PrefetchScalarGridSpec(
                num_scalar_prefetch=0,
                grid=(pl.cdiv(R, tr),),
                in_specs=[pl.BlockSpec((tr, D), lambda i: (i, 0)), w_spec],
                out_specs=pl.BlockSpec((tr, D), lambda i: (i, 0)),
            ),
            compiler_params=pltpu.CompilerParams(
                dimension_semantics=("parallel",),
                vmem_limit_bytes=vmem_limit,
            ),
        )(x2, w2)
    else:
        # --- online two-pass: tile the D (reduction) axis ---
        tr = min(256, _round_up(R, 8))
        tr = max(8, (tr // 8) * 8)
        if d_block is not None:
            td = int(d_block)
        else:
            td = (block_budget // (tr * per_elem)) // 128 * 128
        td = max(128, td)
        mask_tail = (D % td) != 0

        w_spec = (pl.BlockSpec((1, td), lambda i, p, k: (0, k)) if w_shared
                  else pl.BlockSpec((tr, td), lambda i, p, k: (i, k)))
        out2 = pl.pallas_call(
            functools.partial(_ws_two_pass_kernel, d_total=D, d_block=td,
                              mask_tail=mask_tail, approx=approx),
            out_shape=jax.ShapeDtypeStruct((R, D), x.dtype),
            grid_spec=pltpu.PrefetchScalarGridSpec(
                num_scalar_prefetch=0,
                grid=(pl.cdiv(R, tr), 2, pl.cdiv(D, td)),
                in_specs=[pl.BlockSpec((tr, td), lambda i, p, k: (i, k)), w_spec],
                out_specs=pl.BlockSpec((tr, td), lambda i, p, k: (i, k)),
                scratch_shapes=[pltpu.VMEM((tr, 1), jnp.float32),
                                pltpu.VMEM((tr, 1), jnp.float32)],
            ),
            compiler_params=pltpu.CompilerParams(
                dimension_semantics=("parallel", "arbitrary", "arbitrary"),
                vmem_limit_bytes=vmem_limit,
            ),
        )(x2, w2)

    out = out2.reshape(*lead, D) if lead else out2.reshape(D)
    return jnp.moveaxis(out, -1, dim)


# ----------------------------------------------------------------------------
# Reference & self-test
# ----------------------------------------------------------------------------
def _reference_weight_softmax(x, weight, dim):
    if dim is None:
        dim = x.ndim - 1
    xf = x.astype(jnp.float32)
    wf = jnp.broadcast_to(weight, x.shape).astype(jnp.float32)
    m = jnp.max(xf, axis=dim, keepdims=True)
    e = wf * jnp.exp(xf - m)
    return e / jnp.sum(e, axis=dim, keepdims=True)


if __name__ == "__main__":
    key = jax.random.PRNGKey(0)
    k1, k2, k3, k4, k5, k6 = jax.random.split(key, 6)

    # 1) Per-element weight, small hidden, last axis (single-pass path).
    x1 = jax.random.normal(k1, (2, 8, 32), dtype=jnp.float32)
    w1 = jax.nn.softplus(jax.random.normal(k2, (2, 8, 32), dtype=jnp.float32))
    o1 = jax.block_until_ready(weight_softmax(x1, w1, dim=-1))
    r1 = _reference_weight_softmax(x1, w1, -1)
    assert o1.shape == x1.shape and o1.dtype == x1.dtype
    assert jnp.allclose(o1, r1, atol=1e-5, rtol=1e-5)
    assert jnp.allclose(jnp.sum(o1, axis=-1), 1.0, atol=1e-5)

    # 2) Softmax along a middle axis.
    x2 = jax.random.normal(k3, (2, 16, 8), dtype=jnp.float32)
    w2 = jax.nn.softplus(jax.random.normal(k4, (2, 16, 8), dtype=jnp.float32))
    o2 = jax.block_until_ready(weight_softmax(x2, w2, dim=1))
    r2 = _reference_weight_softmax(x2, w2, 1)
    assert jnp.allclose(o2, r2, atol=1e-5, rtol=1e-5)

    # 3) Row-shared (per-channel) weight + forced D-tiled online path with a
    #    non-128-multiple tail (exercises masking and the (1, TD) weight spec).
    x3 = jax.random.normal(k5, (4, 8, 320), dtype=jnp.float32)
    w3 = jax.nn.softplus(jax.random.normal(k6, (320,), dtype=jnp.float32))
    o3 = jax.block_until_ready(weight_softmax(x3, w3, dim=-1, d_block=128))
    r3 = _reference_weight_softmax(x3, w3, -1)
    assert jnp.allclose(o3, r3, atol=2e-5, rtol=1e-4)
    assert jnp.allclose(jnp.sum(o3, axis=-1), 1.0, atol=1e-4)

    # 4) bf16 activations with f32 weight (approx-reciprocal path, weight
    #    precision preserved until inside the kernel).
    x4 = jax.random.normal(k1, (2, 8, 32), dtype=jnp.float32).astype(jnp.bfloat16)
    w4 = jax.nn.softplus(jax.random.normal(k2, (2, 8, 32), dtype=jnp.float32))
    o4 = jax.block_until_ready(weight_softmax(x4, w4, dim=-1))
    r4 = _reference_weight_softmax(x4, w4, -1)
    assert o4.dtype == jnp.bfloat16
    assert jnp.allclose(o4.astype(jnp.float32), r4, atol=2e-2, rtol=2e-2)

    print("KERNEL_OK")
</pallas_src>

<mosaic_0001>
module attributes {stable_mosaic.version = 11 : i64} {
  func.func @_ws_single_pass_kernel(%arg0: i32, %arg1: memref<16x32xf32, #tpu.memory_space<vmem>>, %arg2: memref<16x32xf32, #tpu.memory_space<vmem>>, %arg3: memref<16x32xf32, #tpu.memory_space<vmem>>) attributes {dimension_semantics = [#tpu.dimension_semantics<parallel>], iteration_bounds = array<i64: 1>, scalar_prefetch = 0 : i64, scratch_operands = 0 : i64, tpu.core_type = #tpu.core_type<tc>, window_params = [{transform_indices = @transform_0, window_bounds = array<i64: 16, 32>}, {transform_indices = @transform_1, window_bounds = array<i64: 16, 32>}, {transform_indices = @transform_2, window_bounds = array<i64: 16, 32>}]} {
    %c0 = arith.constant 0 : index
    %c0_0 = arith.constant 0 : index
    %0 = vector.load %arg1[%c0, %c0_0] : memref<16x32xf32, #tpu.memory_space<vmem>>, vector<16x32xf32>
    %c0_1 = arith.constant 0 : index
    %c0_2 = arith.constant 0 : index
    %1 = vector.load %arg2[%c0_1, %c0_2] : memref<16x32xf32, #tpu.memory_space<vmem>>, vector<16x32xf32>
    %cst = arith.constant dense<0xFF800000> : vector<16xf32>
    %2 = vector.multi_reduction <maximumf>, %0, %cst [1] : vector<16x32xf32> to vector<16xf32>
    %3 = vector.shape_cast %2 : vector<16xf32> to vector<16x1xf32>
    %4 = vector.broadcast %3 : vector<16x1xf32> to vector<16x32xf32>
    %5 = arith.subf %0, %4 : vector<16x32xf32>
    %6 = math.exp %5 : vector<16x32xf32>
    %7 = arith.mulf %1, %6 : vector<16x32xf32>
    %cst_3 = arith.constant dense<0.000000e+00> : vector<16xf32>
    %8 = vector.multi_reduction <add>, %7, %cst_3 [1] : vector<16x32xf32> to vector<16xf32>
    %9 = vector.shape_cast %8 : vector<16xf32> to vector<16x1xf32>
    %10 = tpu.reciprocal %9 : vector<16x1xf32> -> vector<16x1xf32>
    %11 = vector.broadcast %10 : vector<16x1xf32> to vector<16x32xf32>
    %12 = arith.mulf %7, %11 : vector<16x32xf32>
    %c0_4 = arith.constant 0 : index
    %c0_5 = arith.constant 0 : index
    %13 = vector.load %arg3[%c0_4, %c0_5] : memref<16x32xf32, #tpu.memory_space<vmem>>, vector<16x32xf32>
    tpu.vector_store %arg3[%c0_4, %c0_5], %12 {strides = array<i32>} : memref<16x32xf32, #tpu.memory_space<vmem>>, vector<16x32xf32>,
    return
  }
  func.func @transform_0(%arg0: i32) -> (i32, i32) {
    %c0_i32 = arith.constant 0 : i32
    %c0_i32_0 = arith.constant 0 : i32
    return %arg0, %c0_i32 : i32, i32
  }
  func.func @transform_1(%arg0: i32) -> (i32, i32) {
    %c0_i32 = arith.constant 0 : i32
    %c0_i32_0 = arith.constant 0 : i32
    return %arg0, %c0_i32 : i32, i32
  }
  func.func @transform_2(%arg0: i32) -> (i32, i32) {
    %c0_i32 = arith.constant 0 : i32
    %c0_i32_0 = arith.constant 0 : i32
    return %arg0, %c0_i32 : i32, i32
  }
}

</mosaic_0001>

<bundles_post_ra>
// kernel: weight_softmax.1
= control target key start
LH: loop header
LB: loop body
LE: loop exit
PB: predicated region body
PF: predicated region fallthrough
CT: control target
= control target key end

     0   :  { %7 = vsyncpa [#allocation3], 0  ;;  %s245_s0 = inlined_call_operand.hbm [shape: f32[16,32], index: 0, kind: input, shape index: {}]   ;;  %s246_s1 = inlined_call_operand.hbm [shape: f32[16,32], index: 1, kind: input, shape index: {}]   ;;  %s247_s2 = inlined_call_operand.hbm [shape: f32[16,32], index: 2, kind: output, shape index: {}]  }
   0x1   :  { %8 = vsyncpa [#allocation6], 0 }
   0x2   :  { %9 = vsyncpa [#allocation4], 0  ;;  %s174_s9 = smov [#allocation2]   ;;  %s102_s13 = scalar_lea.hbm %s245_s0, 256 }
   0x3   :  { %s15_s10 = sshll.u32 %s174_s9, 4  ;;  %p103_p0 = scmp.ne.s32.totalorder %s245_s0, %s102_s13  ;;  %s16_s10 = int_to_ptr.vmem [resolvable:$true] %s15_s10 }
   0x4   :  { %p106_p1 = scmp.lt.u32.totalorder %s102_s13, %s245_s0 }
   0x6   :  { %p108_p2 = pnand %p106_p1, %p103_p0 }
   0x8   :  { %111 = shalt.err (!%p108_p2)
}
   0x9   :  { %s112_s18 = scalar_lea.vmem %s16_s10, 256  ;;  %p117_p4 = scmp.lt.s32.totalorder %s16_s10, %s16_s10 }
   0xa   :  { %p113_p3 = scmp.ne.s32.totalorder %s16_s10, %s112_s18  ;;  %p118_p5 = scmp.lt.s32.totalorder %s112_s18, %s112_s18 }
   0xc   :  { %p119_p6 = por %p118_p5, %p117_p4 }
   0xe   :  { %p120_p7 = pnand %p119_p6, %p113_p3 }
  0x10   :  { %123 = shalt.err (!%p120_p7)
}
  0x11   :  { %s175_s19 = smov 128   ;;  %s176_s20 = smov 8  }
  0x12   :  { %21 = dma.hbm_to_vmem [thread:$0]  %s245_s0, 256, %s16_s10, [#allocation3], %s175_s19, %s175_s19, %s176_s20  }
  0x13   :  { %s177_s23 = smov [#allocation5]   ;;  %s124_s27 = scalar_lea.hbm %s246_s1, 256 }
  0x14   :  { %s27_s24 = sshll.u32 %s177_s23, 4  ;;  %p125_p8 = scmp.ne.s32.totalorder %s246_s1, %s124_s27  ;;  %s28_s24 = int_to_ptr.vmem [resolvable:$true] %s27_s24 }
  0x15   :  { %p128_p9 = scmp.lt.u32.totalorder %s124_s27, %s246_s1 }
  0x17   :  { %p130_p10 = pnand %p128_p9, %p125_p8 }
  0x19   :  { %133 = shalt.err (!%p130_p10)
}
  0x1a   :  { %s134_s4 = scalar_lea.vmem %s28_s24, 256  ;;  %p139_p12 = scmp.lt.s32.totalorder %s28_s24, %s28_s24 }
  0x1b   :  { %p135_p11 = scmp.ne.s32.totalorder %s28_s24, %s134_s4  ;;  %p140_p13 = scmp.lt.s32.totalorder %s134_s4, %s134_s4 }
  0x1d   :  { %p141_p0 = por %p140_p13, %p139_p12 }
  0x1f   :  { %p142_p1 = pnand %p141_p0, %p135_p11 }
  0x21   :  { %145 = shalt.err (!%p142_p1)
}
  0x22   :  { %33 = dma.hbm_to_vmem [thread:$0]  %s246_s1, 256, %s28_s24, [#allocation6], %s175_s19, %s175_s19, %s176_s20  }
  0x23   :  { %168 = dma.done.wait [#allocation3], 256  }
  0x24   :  { %169 = vsyncadd [#allocation3], 4294967040 }
  0x25   :  { %170 = dma.done.wait [#allocation6], 256  }
  0x26   :  { %171 = vsyncadd [#allocation6], 4294967040  ;;  %vm44_vm0 = vcmask 261120   ;;  %v40_v0 = vld [vmem:[#allocation2] sm:$0xff]  ;;  %v41_v1 = vld [vmem:[#allocation2 + $0x8] sm:$0xff]  ;;  %s178_s1 = smov [#allocation7]  }
  0x27   :  { %v45_v2 = vsel %vm44_vm0, %v40_v0, -inf  ;;  %v48_v3 = vsel %vm44_vm0, %v41_v1, -inf  ;;  %v42_v10 = vld [vmem:[#allocation5] sm:$0xff]  ;;  %v43_v13 = vld [vmem:[#allocation5 + $0x8] sm:$0xff]  ;;  %s76_s6 = sshll.u32 %s178_s1, 4  ;;  %s77_s6 = int_to_ptr.vmem [resolvable:$true] %s76_s6 }
  0x28   :  { %46 = vmax.xlane.f32.xlu0 %v45_v2  ;;  %s146_s7 = scalar_lea.vmem %s77_s6, 256  ;;  %p151_p3 = scmp.lt.s32.totalorder %s77_s6, %s77_s6 }
  0x29   :  { %p147_p2 = scmp.ne.s32.totalorder %s77_s6, %s146_s7  ;;  %p152_p4 = scmp.lt.s32.totalorder %s146_s7, %s146_s7 }
  0x2b   :  { %p153_p5 = por %p152_p4, %p151_p3 }
  0x2c   :  { %49 = vmax.xlane.f32.xlu0 %v48_v3 }
  0x2d   :  { %p154_p6 = pnand %p153_p5, %p147_p2 }
  0xb5   :  { %v47_v4 = vpop.xlane.xlu0 %46 }
  0xb6   :  { %v51_v5 = vsub.f32 %v40_v0, %v47_v4 }
  0xb8   :  { %v53_v6 = vmul.f32 1.442695, %v51_v5 }
  0xb9   :  { %v50_v7 = vpop.xlane.xlu0 %49 }
  0xba   :  { %94 = vpow2.f32 %v53_v6  ;;  %v52_v8 = vsub.f32 %v41_v1, %v50_v7 }
  0xbc   :  { %v55_v9 = vmul.f32 1.442695, %v52_v8 }
  0xbe   :  { %96 = vpow2.f32 %v55_v9 }
  0xc4   :  { %v95_v11 = vpop.eup %94 }
  0xc5   :  { %v57_v12 = vmul.f32 %v95_v11, %v42_v10 }
  0xc7   :  { %v59_v14 = vsel %vm44_vm0, %v57_v12, 0.0 }
  0xc8   :  { %v97_v15 = vpop.eup %96  ;;  %60 = vadd.xlane.f32.xlu1 %v59_v14 }
  0xc9   :  { %v58_v16 = vmul.f32 %v97_v15, %v43_v13 }
  0xcb   :  { %v62_v17 = vsel %vm44_vm0, %v58_v16, 0.0 }
  0xcc   :  { %63 = vadd.xlane.f32.xlu1 %v62_v17 }
 0x155   :  { %v61_v18 = vpop.xlane.xlu1 %60 }
 0x156   :  { %98 = vrcp.f32 %v61_v18 }
 0x159   :  { %v64_v19 = vpop.xlane.xlu1 %63 }
 0x15a   :  { %100 = vrcp.f32 %v64_v19 }
 0x160   :  { %v99_v20 = vpop.eup %98 }
 0x161   :  { %v67_v21 = vmul.f32 %v99_v20, %v57_v12 }
 0x163   :  { %69 = vst.msk [vmem:[#allocation7] sm:$0xff] %vm44_vm0, %v67_v21 }
 0x164   :  { %v101_v22 = vpop.eup %100 }
 0x165   :  { %v68_v23 = vmul.f32 %v101_v22, %v58_v16 }
 0x167   :  { %70 = vst.msk [vmem:[#allocation7 + $0x8] sm:$0xff] %vm44_vm0, %v68_v23 }
 0x168   :  { %157 = shalt.err (!%p154_p6)
}
 0x169   :  { %s158_s10 = scalar_lea.hbm %s247_s2, 256 }
 0x16a   :  { %p159_p7 = scmp.ne.s32.totalorder %s247_s2, %s158_s10  ;;  %p162_p8 = scmp.lt.u32.totalorder %s158_s10, %s247_s2 }
 0x16c   :  { %p164_p9 = pnand %p162_p8, %p159_p7 }
 0x16e   :  { %167 = shalt.err (!%p164_p9)
}
 0x16f   :  { %82 = dma.vmem_to_hbm [thread:$0]  %s77_s6, 256, %s247_s2, [#allocation4], %s175_s19, %s175_s19, %s176_s20  }
 0x170   :  { %172 = dma.done.wait [#allocation4], 256  }
 0x171   :  { %173 = vsyncadd [#allocation4], 4294967040 }
 0x172   :  { %86 = vsyncpa [#allocation3], 1 }
 0x173   :  { %87 = vsyncpa [#allocation6], 1 }
 0x174   :  { %88 = vsyncpa [#allocation4], 1 }

</bundles_post_ra>
